<compile_context>
chip_gen: v7x
topology: tpu7x:2x2x1
jax: 0.10.0
libtpu: 0.0.40
codegen_flags: <defaults>
</compile_context>

<pallas_src>
import math
from typing import NamedTuple, Optional

import jax
import jax.numpy as jnp
from jax.experimental import pallas as pl
from jax.experimental.pallas import tpu as pltpu


def _round_up(x: int, m: int) -> int:
    return (x + m - 1) // m * m


def _vmem_cap_bytes() -> int:
    """Physical VMEM per TensorCore (64 MiB v7x, 128 MiB v5e/v6e)."""
    try:
        return int(pltpu.get_tpu_info().vmem_capacity_bytes)
    except Exception:
        return 64 * 1024 * 1024  # conservative (v7x-sized) fallback


class MLPAdapterParams(NamedTuple):
    w1: jax.Array        # (in_dim, hid_p)  compute dtype
    b1: jax.Array        # (1, hid_p)       f32
    w2: jax.Array        # (hid_p, out_p)   compute dtype
    b2: jax.Array        # (1, out_p)       f32
    in_dim: int
    hidden_dim: int
    out_dim: int
    hid_p: int
    out_p: int
    hk: int              # hidden-dim chunk (== hid_p when weights fully resident)


def prepare_mlp_adapter_params(w1, b1, w2, b2, *,
                               mxu_dtype=jnp.bfloat16,
                               hidden_chunk: Optional[int] = None
                               ) -> MLPAdapterParams:
    """Pad/cast the weights once (hoist this out of the per-call hot path)."""
    in_dim, hidden_dim = w1.shape
    out_dim = w2.shape[1]
    cdt = jnp.dtype(w1.dtype) if mxu_dtype is None else jnp.dtype(mxu_dtype)
    cdt_bytes = cdt.itemsize
    out_p = _round_up(out_dim, 128)          # lane-dense output stores
    cap = _vmem_cap_bytes()

    if hidden_chunk is not None:
        hk = int(hidden_chunk)
    else:
        full_w_bytes = (in_dim * hidden_dim + hidden_dim * out_p) * cdt_bytes
        if full_w_bytes <= int(0.4 * cap):
            hk = hidden_dim                   # whole weights stay resident
        else:
            # double-buffered per-chunk weights should stay <= ~20% of VMEM
            per_hidden = 2 * (in_dim + out_p) * cdt_bytes
            hk = max(128, (int(0.2 * cap) // per_hidden) // 128 * 128)

    if hk >= hidden_dim:
        hk = hidden_dim
        hid_p = hidden_dim                    # no hidden padding needed
    else:
        if hk % 128 != 0:
            raise ValueError("hidden_chunk must be a multiple of 128 "
                             "or >= hidden_dim")
        hid_p = _round_up(hidden_dim, hk)

    f32 = jnp.float32
    # Zero weight columns/rows + zero bias entries keep every padded lane
    # exactly zero through bias-add, ReLU and the second matmul.
    if hid_p == hidden_dim:
        w1p = w1.astype(cdt)
        b1p = b1.reshape(1, hidden_dim).astype(f32)
    else:
        w1p = jnp.zeros((in_dim, hid_p), cdt).at[:, :hidden_dim].set(w1.astype(cdt))
        b1p = jnp.zeros((1, hid_p), f32).at[0, :hidden_dim].set(b1.astype(f32))
    if hid_p == hidden_dim and out_p == out_dim:
        w2p = w2.astype(cdt)
    else:
        w2p = jnp.zeros((hid_p, out_p), cdt).at[:hidden_dim, :out_dim].set(
            w2.astype(cdt))
    if out_p == out_dim:
        b2p = b2.reshape(1, out_dim).astype(f32)
    else:
        b2p = jnp.zeros((1, out_p), f32).at[0, :out_dim].set(b2.astype(f32))

    return MLPAdapterParams(w1p, b1p, w2p, b2p, in_dim, hidden_dim, out_dim,
                            hid_p, out_p, hk)


def _mlp_adapter_kernel(x_ref, w1_ref, b1_ref, w2_ref, b2_ref, o_ref, acc_ref):
    # x_ref : (tm, in_dim)  original dtype (cast to MXU dtype in-kernel)
    # w1_ref: (in_dim, hk)  compute dtype     b1_ref: (1, hk)    f32
    # w2_ref: (hk, out_p)   compute dtype     b2_ref: (1, out_p) f32
    # o_ref : (tm, out_p)   original dtype    acc_ref: (tm, out_p) f32 scratch
    k = pl.program_id(1)

    @pl.when(k == 0)
    def _():
        acc_ref[...] = jnp.zeros_like(acc_ref)

    x = x_ref[...].astype(w1_ref.dtype)            # cast rides a free VPU slot
    h = jnp.dot(x, w1_ref[...], preferred_element_type=jnp.float32)
    h = jnp.maximum(h + b1_ref[...], 0.0)          # bias + ReLU in f32
    acc_ref[...] += jnp.dot(h.astype(w2_ref.dtype), w2_ref[...],
                            preferred_element_type=jnp.float32)

    @pl.when(k == pl.num_programs(1) - 1)
    def _():
        o_ref[...] = (acc_ref[...] + b2_ref[...]).astype(o_ref.dtype)


def mlp_adapter_prepared(x, p: MLPAdapterParams, *, tm: Optional[int] = None):
    """Apply the fused MLP adapter with pre-prepared (padded/cast) params."""
    orig_dtype = x.dtype
    lead_shape = x.shape[:-1]
    assert x.shape[-1] == p.in_dim
    M = int(math.prod(lead_shape)) if lead_shape else 1
    x2d = x.reshape(M, p.in_dim)

    cap = _vmem_cap_bytes()
    x_bytes = jnp.dtype(orig_dtype).itemsize
    cdt_bytes = jnp.dtype(p.w1.dtype).itemsize
    out_bytes = x_bytes
    # bf16 packs two rows per sublane -> 16-row alignment; f32 -> 8.
    sub = 16 if min(x_bytes, cdt_bytes) < 4 else 8

    grid_k = p.hid_p // p.hk
    w_bufs = 1 if grid_k == 1 else 2      # grid-invariant weights single-buffered

    if tm is None:
        tm = 1024 if cap >= (100 << 20) else 512   # v5e/v6e vs v7x default
    tm_eff = _round_up(min(tm, _round_up(M, sub)), sub)

    fixed_bytes = (w_bufs * (p.in_dim * p.hk + p.hk * p.out_p) * cdt_bytes
                   + w_bufs * 8 * (p.hk + p.out_p) * 4)     # sublane-padded biases

    def vmem_need(t):
        return (fixed_bytes
                + 2 * t * p.in_dim * x_bytes      # x tile (double-buffered)
                + 2 * t * p.out_p * out_bytes     # out tile (double-buffered)
                + t * p.out_p * 4                 # f32 accumulator scratch
                + t * p.in_dim * cdt_bytes        # in-kernel x cast copy
                + t * p.hk * (4 + cdt_bytes))     # f32 h + its cast copy

    budget = int(0.8 * cap)
    while vmem_need(tm_eff) > budget and tm_eff > sub:
        tm_eff = max(sub, _round_up(tm_eff // 2, sub))

    # v7x has 2 TensorCores: make sure the "parallel" row axis has >= 2 steps
    # (harmless on v5e/v6e).  Don't shrink tiny problems below 128 rows.
    while pl.cdiv(M, tm_eff) < 2 and tm_eff >= 256:
        tm_eff = _round_up(tm_eff // 2, sub)

    M_p = _round_up(M, tm_eff)
    if M_p != M:
        # TODO(synk): rely on Pallas boundary masking instead of a pad copy.
        x2d = jnp.pad(x2d, ((0, M_p - M), (0, 0)))
    grid_rows = M_p // tm_eff

    vmem_limit = int(min(max(int(1.25 * vmem_need(tm_eff)), 32 << 20),
                         int(0.85 * cap)))

    flops = 2 * M * (p.in_dim * p.hidden_dim + p.hidden_dim * p.out_dim)
    bytes_accessed = (M * p.in_dim * x_bytes + M * p.out_p * out_bytes
                      + (p.in_dim * p.hid_p + p.hid_p * p.out_p) * cdt_bytes)
    cost = pl.CostEstimate(flops=flops, transcendentals=0,
                           bytes_accessed=bytes_accessed)

    def run(single_buffer_weights: bool):
        if single_buffer_weights and grid_k == 1:
            w_kw = dict(pipeline_mode=pl.Buffered(1))   # weights DMA'd once
        else:
            w_kw = {}
        grid_spec = pltpu.PrefetchScalarGridSpec(
            num_scalar_prefetch=0,
            grid=(grid_rows, grid_k),
            in_specs=[
                pl.BlockSpec((tm_eff, p.in_dim), lambda i, k: (i, 0)),
                pl.BlockSpec((p.in_dim, p.hk), lambda i, k: (0, k), **w_kw),
                pl.BlockSpec((1, p.hk), lambda i, k: (0, k), **w_kw),
                pl.BlockSpec((p.hk, p.out_p), lambda i, k: (k, 0), **w_kw),
                pl.BlockSpec((1, p.out_p), lambda i, k: (0, 0), **w_kw),
            ],
            out_specs=pl.BlockSpec((tm_eff, p.out_p), lambda i, k: (i, 0)),
            scratch_shapes=[pltpu.VMEM((tm_eff, p.out_p), jnp.float32)],
        )
        return pl.pallas_call(
            _mlp_adapter_kernel,
            out_shape=jax.ShapeDtypeStruct((M_p, p.out_p), orig_dtype),
            grid_spec=grid_spec,
            compiler_params=pltpu.CompilerParams(
                dimension_semantics=("parallel", "arbitrary"),
                vmem_limit_bytes=vmem_limit,
            ),
            cost_estimate=cost,
        )(x2d, p.w1, p.b1, p.w2, p.b2)

    if grid_k == 1:
        try:
            out_pad = run(True)
        except Exception:
            out_pad = run(False)   # fall back if single-buffer hint is rejected
    else:
        out_pad = run(False)

    out = out_pad[:M, :p.out_dim]
    return out.reshape(*lead_shape, p.out_dim)


def mlp_adapter(x, w1, b1, w2, b2, *, mxu_dtype=jnp.bfloat16, tm=None,
                hidden_chunk=None):
    """Fused Linear->ReLU->Linear matching the PyTorch MLP_adapter forward.

    Convenience wrapper; for repeated calls hoist prepare_mlp_adapter_params()
    out of the hot path so the weight pad/cast happens once.
    """
    params = prepare_mlp_adapter_params(w1, b1, w2, b2, mxu_dtype=mxu_dtype,
                                        hidden_chunk=hidden_chunk)
    return mlp_adapter_prepared(x, params, tm=tm)


def _init_params(key, in_dim, hidden_dim, out_dim):
    """Deterministic init mimicking nn.Linear's U(-1/sqrt(fan_in), 1/sqrt(fan_in))."""
    k1, k2, k3, k4 = jax.random.split(key, 4)
    lim1 = 1.0 / (in_dim ** 0.5)
    lim2 = 1.0 / (hidden_dim ** 0.5)
    w1 = jax.random.uniform(k1, (in_dim, hidden_dim), jnp.float32, -lim1, lim1)
    b1 = jax.random.uniform(k2, (hidden_dim,), jnp.float32, -lim1, lim1)
    w2 = jax.random.uniform(k3, (hidden_dim, out_dim), jnp.float32, -lim2, lim2)
    b2 = jax.random.uniform(k4, (out_dim,), jnp.float32, -lim2, lim2)
    return w1, b1, w2, b2


if __name__ == "__main__":
    # Small shapes consistent with the module: batch=2, seq=8, in=32, hidden=64, out=32
    B, S = 2, 8
    in_dim, hidden_dim, out_dim = 32, 64, 32

    key = jax.random.PRNGKey(0)
    kx, kp = jax.random.split(key)
    x = jax.random.normal(kx, (B, S, in_dim), jnp.float32)
    w1, b1, w2, b2 = _init_params(kp, in_dim, hidden_dim, out_dim)

    # Pure-JAX f32 reference
    ref = jnp.maximum(x @ w1 + b1, 0.0) @ w2 + b2

    # Exact f32 path: must match the reference tightly.
    out_f32 = jax.block_until_ready(
        mlp_adapter(x, w1, b1, w2, b2, mxu_dtype=None))
    assert out_f32.shape == (B, S, out_dim)
    assert jnp.allclose(out_f32, ref, atol=1e-5, rtol=1e-5)

    # Default bf16-operand / f32-accumulation fast path.
    out_bf16 = jax.block_until_ready(mlp_adapter(x, w1, b1, w2, b2))
    assert out_bf16.shape == (B, S, out_dim)
    assert jnp.allclose(out_bf16, ref, atol=3e-2, rtol=3e-2)

    # Exercise the hidden-chunk (accumulator) path used for wide adapters.
    hidden2 = 256
    w1b, b1b, w2b, b2b = _init_params(jax.random.PRNGKey(1), in_dim, hidden2, out_dim)
    ref2 = jnp.maximum(x @ w1b + b1b, 0.0) @ w2b + b2b
    out_chunk = jax.block_until_ready(
        mlp_adapter(x, w1b, b1b, w2b, b2b, mxu_dtype=None, hidden_chunk=128))
    assert out_chunk.shape == (B, S, out_dim)
    assert jnp.allclose(out_chunk, ref2, atol=1e-4, rtol=1e-4)

    print("KERNEL_OK")
</pallas_src>

<mosaic_0001>
module attributes {stable_mosaic.version = 11 : i64} {
  func.func @_mlp_adapter_kernel(%arg0: i32, %arg1: i32, %arg2: memref<16x32xf32, #tpu.memory_space<vmem>>, %arg3: memref<32x64xf32, #tpu.memory_space<vmem>>, %arg4: memref<1x64xf32, #tpu.memory_space<vmem>>, %arg5: memref<64x128xf32, #tpu.memory_space<vmem>>, %arg6: memref<1x128xf32, #tpu.memory_space<vmem>>, %arg7: memref<16x128xf32, #tpu.memory_space<vmem>>, %arg8: memref<16x128xf32, #tpu.memory_space<vmem>>) attributes {dimension_semantics = [#tpu.dimension_semantics<parallel>, #tpu.dimension_semantics<arbitrary>], iteration_bounds = array<i64: 1, 1>, scalar_prefetch = 0 : i64, scratch_operands = 1 : i64, tpu.core_type = #tpu.core_type<tc>, window_params = [{transform_indices = @transform_0, window_bounds = array<i64: 16, 32>}, {pipeline_mode = #tpu.pipeline_mode<synchronous>, transform_indices = @transform_1, window_bounds = array<i64: 32, 64>}, {pipeline_mode = #tpu.pipeline_mode<synchronous>, transform_indices = @transform_2, window_bounds = array<i64: 1, 64>}, {pipeline_mode = #tpu.pipeline_mode<synchronous>, transform_indices = @transform_3, window_bounds = array<i64: 64, 128>}, {pipeline_mode = #tpu.pipeline_mode<synchronous>, transform_indices = @transform_4, window_bounds = array<i64: 1, 128>}, {transform_indices = @transform_5, window_bounds = array<i64: 16, 128>}]} {
    %c0_i32 = arith.constant 0 : i32
    %0 = arith.cmpi eq, %arg1, %c0_i32 : i32
    %1 = arith.extui %0 : i1 to i32
    %c0_i32_0 = arith.constant 0 : i32
    %2 = arith.cmpi ne, %1, %c0_i32_0 : i32
    scf.if %2 {
      %cst_16 = arith.constant 0.000000e+00 : f32
      %19 = vector.broadcast %cst_16 : f32 to vector<16x128xf32>
      %c0_17 = arith.constant 0 : index
      %c0_18 = arith.constant 0 : index
      %20 = vector.load %arg8[%c0_17, %c0_18] : memref<16x128xf32, #tpu.memory_space<vmem>>, vector<16x128xf32>
      tpu.vector_store %arg8[%c0_17, %c0_18], %19 {strides = array<i32>} : memref<16x128xf32, #tpu.memory_space<vmem>>, vector<16x128xf32>,
    } else {
    }
    %c0 = arith.constant 0 : index
    %c0_1 = arith.constant 0 : index
    %3 = vector.load %arg2[%c0, %c0_1] : memref<16x32xf32, #tpu.memory_space<vmem>>, vector<16x32xf32>
    %c0_2 = arith.constant 0 : index
    %c0_3 = arith.constant 0 : index
    %4 = vector.load %arg3[%c0_2, %c0_3] : memref<32x64xf32, #tpu.memory_space<vmem>>, vector<32x64xf32>
    %cst = arith.constant dense<0.000000e+00> : vector<16x64xf32>
    %5 = tpu.matmul %3, %4, %cst {dimension_numbers = #tpu.dot_dimension_numbers<[1], [0], [0], [1], [0, 0, 1, 1], [], []>} : vector<16x32xf32>, vector<32x64xf32>, vector<16x64xf32> -> vector<16x64xf32>
    %c0_4 = arith.constant 0 : index
    %c0_5 = arith.constant 0 : index
    %6 = vector.load %arg4[%c0_4, %c0_5] : memref<1x64xf32, #tpu.memory_space<vmem>>, vector<1x64xf32>
    %7 = vector.broadcast %6 : vector<1x64xf32> to vector<16x64xf32>
    %8 = arith.addf %5, %7 : vector<16x64xf32>
    %cst_6 = arith.constant 0.000000e+00 : f32
    %9 = vector.broadcast %cst_6 : f32 to vector<16x64xf32>
    %10 = arith.maximumf %8, %9 : vector<16x64xf32>
    %c0_7 = arith.constant 0 : index
    %c0_8 = arith.constant 0 : index
    %11 = vector.load %arg8[%c0_7, %c0_8] : memref<16x128xf32, #tpu.memory_space<vmem>>, vector<16x128xf32>
    %c0_9 = arith.constant 0 : index
    %c0_10 = arith.constant 0 : index
    %12 = vector.load %arg5[%c0_9, %c0_10] : memref<64x128xf32, #tpu.memory_space<vmem>>, vector<64x128xf32>
    %cst_11 = arith.constant dense<0.000000e+00> : vector<16x128xf32>
    %13 = tpu.matmul %10, %12, %cst_11 {dimension_numbers = #tpu.dot_dimension_numbers<[1], [0], [0], [1], [0, 0, 1, 1], [], []>} : vector<16x64xf32>, vector<64x128xf32>, vector<16x128xf32> -> vector<16x128xf32>
    %14 = arith.addf %11, %13 : vector<16x128xf32>
    %c0_12 = arith.constant 0 : index
    %c0_13 = arith.constant 0 : index
    %15 = vector.load %arg8[%c0_12, %c0_13] : memref<16x128xf32, #tpu.memory_space<vmem>>, vector<16x128xf32>
    tpu.vector_store %arg8[%c0_12, %c0_13], %14 {strides = array<i32>} : memref<16x128xf32, #tpu.memory_space<vmem>>, vector<16x128xf32>,
    %c0_i32_14 = arith.constant 0 : i32
    %16 = arith.cmpi eq, %arg1, %c0_i32_14 : i32
    %17 = arith.extui %16 : i1 to i32
    %c0_i32_15 = arith.constant 0 : i32
    %18 = arith.cmpi ne, %17, %c0_i32_15 : i32
    scf.if %18 {
      %c0_16 = arith.constant 0 : index
      %c0_17 = arith.constant 0 : index
      %19 = vector.load %arg8[%c0_16, %c0_17] : memref<16x128xf32, #tpu.memory_space<vmem>>, vector<16x128xf32>
      %c0_18 = arith.constant 0 : index
      %c0_19 = arith.constant 0 : index
      %20 = vector.load %arg6[%c0_18, %c0_19] : memref<1x128xf32, #tpu.memory_space<vmem>>, vector<1x128xf32>
      %21 = vector.broadcast %20 : vector<1x128xf32> to vector<16x128xf32>
      %22 = arith.addf %19, %21 : vector<16x128xf32>
      %c0_20 = arith.constant 0 : index
      %c0_21 = arith.constant 0 : index
      %23 = vector.load %arg7[%c0_20, %c0_21] : memref<16x128xf32, #tpu.memory_space<vmem>>, vector<16x128xf32>
      tpu.vector_store %arg7[%c0_20, %c0_21], %22 {strides = array<i32>} : memref<16x128xf32, #tpu.memory_space<vmem>>, vector<16x128xf32>,
    } else {
    }
    return
  }
  func.func @transform_0(%arg0: i32, %arg1: i32) -> (i32, i32) {
    %c0_i32 = arith.constant 0 : i32
    %c0_i32_0 = arith.constant 0 : i32
    return %arg0, %c0_i32 : i32, i32
  }
  func.func @transform_1(%arg0: i32, %arg1: i32) -> (i32, i32) {
    %c0_i32 = arith.constant 0 : i32
    %c0_i32_0 = arith.constant 0 : i32
    return %c0_i32, %arg1 : i32, i32
  }
  func.func @transform_2(%arg0: i32, %arg1: i32) -> (i32, i32) {
    %c0_i32 = arith.constant 0 : i32
    %c0_i32_0 = arith.constant 0 : i32
    return %c0_i32, %arg1 : i32, i32
  }
  func.func @transform_3(%arg0: i32, %arg1: i32) -> (i32, i32) {
    %c0_i32 = arith.constant 0 : i32
    %c0_i32_0 = arith.constant 0 : i32
    return %arg1, %c0_i32 : i32, i32
  }
  func.func @transform_4(%arg0: i32, %arg1: i32) -> (i32, i32) {
    %c0_i32 = arith.constant 0 : i32
    %c0_i32_0 = arith.constant 0 : i32
    %c0_i32_1 = arith.constant 0 : i32
    return %c0_i32, %c0_i32_0 : i32, i32
  }
  func.func @transform_5(%arg0: i32, %arg1: i32) -> (i32, i32) {
    %c0_i32 = arith.constant 0 : i32
    %c0_i32_0 = arith.constant 0 : i32
    return %arg0, %c0_i32 : i32, i32
  }
}

module attributes {stable_mosaic.version = 11 : i64} {
  func.func @_mlp_adapter_kernel(%arg0: i32, %arg1: i32, %arg2: memref<16x32xf32, #tpu.memory_space<vmem>>, %arg3: memref<32x64xf32, #tpu.memory_space<vmem>>, %arg4: memref<1x64xf32, #tpu.memory_space<vmem>>, %arg5: memref<64x128xf32, #tpu.memory_space<vmem>>, %arg6: memref<1x128xf32, #tpu.memory_space<vmem>>, %arg7: memref<16x128xf32, #tpu.memory_space<vmem>>, %arg8: memref<16x128xf32, #tpu.memory_space<vmem>>) attributes {dimension_semantics = [#tpu.dimension_semantics<parallel>, #tpu.dimension_semantics<arbitrary>], iteration_bounds = array<i64: 1, 1>, scalar_prefetch = 0 : i64, scratch_operands = 1 : i64, tpu.core_type = #tpu.core_type<tc>, window_params = [{transform_indices = @transform_0, window_bounds = array<i64: 16, 32>}, {transform_indices = @transform_1, window_bounds = array<i64: 32, 64>}, {transform_indices = @transform_2, window_bounds = array<i64: 1, 64>}, {transform_indices = @transform_3, window_bounds = array<i64: 64, 128>}, {pipeline_mode = #tpu.pipeline_mode<synchronous>, transform_indices = @transform_4, window_bounds = array<i64: 1, 128>}, {transform_indices = @transform_5, window_bounds = array<i64: 16, 128>}]} {
    %c0_i32 = arith.constant 0 : i32
    %0 = arith.cmpi eq, %arg1, %c0_i32 : i32
    %1 = arith.extui %0 : i1 to i32
    %c0_i32_0 = arith.constant 0 : i32
    %2 = arith.cmpi ne, %1, %c0_i32_0 : i32
    scf.if %2 {
      %cst_16 = arith.constant 0.000000e+00 : f32
      %19 = vector.broadcast %cst_16 : f32 to vector<16x128xf32>
      %c0_17 = arith.constant 0 : index
      %c0_18 = arith.constant 0 : index
      %20 = vector.load %arg8[%c0_17, %c0_18] : memref<16x128xf32, #tpu.memory_space<vmem>>, vector<16x128xf32>
      tpu.vector_store %arg8[%c0_17, %c0_18], %19 {strides = array<i32>} : memref<16x128xf32, #tpu.memory_space<vmem>>, vector<16x128xf32>,
    } else {
    }
    %c0 = arith.constant 0 : index
    %c0_1 = arith.constant 0 : index
    %3 = vector.load %arg2[%c0, %c0_1] : memref<16x32xf32, #tpu.memory_space<vmem>>, vector<16x32xf32>
    %c0_2 = arith.constant 0 : index
    %c0_3 = arith.constant 0 : index
    %4 = vector.load %arg3[%c0_2, %c0_3] : memref<32x64xf32, #tpu.memory_space<vmem>>, vector<32x64xf32>
    %cst = arith.constant dense<0.000000e+00> : vector<16x64xf32>
    %5 = tpu.matmul %3, %4, %cst {dimension_numbers = #tpu.dot_dimension_numbers<[1], [0], [0], [1], [0, 0, 1, 1], [], []>} : vector<16x32xf32>, vector<32x64xf32>, vector<16x64xf32> -> vector<16x64xf32>
    %c0_4 = arith.constant 0 : index
    %c0_5 = arith.constant 0 : index
    %6 = vector.load %arg4[%c0_4, %c0_5] : memref<1x64xf32, #tpu.memory_space<vmem>>, vector<1x64xf32>
    %7 = vector.broadcast %6 : vector<1x64xf32> to vector<16x64xf32>
    %8 = arith.addf %5, %7 : vector<16x64xf32>
    %cst_6 = arith.constant 0.000000e+00 : f32
    %9 = vector.broadcast %cst_6 : f32 to vector<16x64xf32>
    %10 = arith.maximumf %8, %9 : vector<16x64xf32>
    %c0_7 = arith.constant 0 : index
    %c0_8 = arith.constant 0 : index
    %11 = vector.load %arg8[%c0_7, %c0_8] : memref<16x128xf32, #tpu.memory_space<vmem>>, vector<16x128xf32>
    %c0_9 = arith.constant 0 : index
    %c0_10 = arith.constant 0 : index
    %12 = vector.load %arg5[%c0_9, %c0_10] : memref<64x128xf32, #tpu.memory_space<vmem>>, vector<64x128xf32>
    %cst_11 = arith.constant dense<0.000000e+00> : vector<16x128xf32>
    %13 = tpu.matmul %10, %12, %cst_11 {dimension_numbers = #tpu.dot_dimension_numbers<[1], [0], [0], [1], [0, 0, 1, 1], [], []>} : vector<16x64xf32>, vector<64x128xf32>, vector<16x128xf32> -> vector<16x128xf32>
    %14 = arith.addf %11, %13 : vector<16x128xf32>
    %c0_12 = arith.constant 0 : index
    %c0_13 = arith.constant 0 : index
    %15 = vector.load %arg8[%c0_12, %c0_13] : memref<16x128xf32, #tpu.memory_space<vmem>>, vector<16x128xf32>
    tpu.vector_store %arg8[%c0_12, %c0_13], %14 {strides = array<i32>} : memref<16x128xf32, #tpu.memory_space<vmem>>, vector<16x128xf32>,
    %c0_i32_14 = arith.constant 0 : i32
    %16 = arith.cmpi eq, %arg1, %c0_i32_14 : i32
    %17 = arith.extui %16 : i1 to i32
    %c0_i32_15 = arith.constant 0 : i32
    %18 = arith.cmpi ne, %17, %c0_i32_15 : i32
    scf.if %18 {
      %c0_16 = arith.constant 0 : index
      %c0_17 = arith.constant 0 : index
      %19 = vector.load %arg8[%c0_16, %c0_17] : memref<16x128xf32, #tpu.memory_space<vmem>>, vector<16x128xf32>
      %c0_18 = arith.constant 0 : index
      %c0_19 = arith.constant 0 : index
      %20 = vector.load %arg6[%c0_18, %c0_19] : memref<1x128xf32, #tpu.memory_space<vmem>>, vector<1x128xf32>
      %21 = vector.broadcast %20 : vector<1x128xf32> to vector<16x128xf32>
      %22 = arith.addf %19, %21 : vector<16x128xf32>
      %c0_20 = arith.constant 0 : index
      %c0_21 = arith.constant 0 : index
      %23 = vector.load %arg7[%c0_20, %c0_21] : memref<16x128xf32, #tpu.memory_space<vmem>>, vector<16x128xf32>
      tpu.vector_store %arg7[%c0_20, %c0_21], %22 {strides = array<i32>} : memref<16x128xf32, #tpu.memory_space<vmem>>, vector<16x128xf32>,
    } else {
    }
    return
  }
  func.func @transform_0(%arg0: i32, %arg1: i32) -> (i32, i32) {
    %c0_i32 = arith.constant 0 : i32
    %c0_i32_0 = arith.constant 0 : i32
    return %arg0, %c0_i32 : i32, i32
  }
  func.func @transform_1(%arg0: i32, %arg1: i32) -> (i32, i32) {
    %c0_i32 = arith.constant 0 : i32
    %c0_i32_0 = arith.constant 0 : i32
    return %c0_i32, %arg1 : i32, i32
  }
  func.func @transform_2(%arg0: i32, %arg1: i32) -> (i32, i32) {
    %c0_i32 = arith.constant 0 : i32
    %c0_i32_0 = arith.constant 0 : i32
    return %c0_i32, %arg1 : i32, i32
  }
  func.func @transform_3(%arg0: i32, %arg1: i32) -> (i32, i32) {
    %c0_i32 = arith.constant 0 : i32
    %c0_i32_0 = arith.constant 0 : i32
    return %arg1, %c0_i32 : i32, i32
  }
  func.func @transform_4(%arg0: i32, %arg1: i32) -> (i32, i32) {
    %c0_i32 = arith.constant 0 : i32
    %c0_i32_0 = arith.constant 0 : i32
    %c0_i32_1 = arith.constant 0 : i32
    return %c0_i32, %c0_i32_0 : i32, i32
  }
  func.func @transform_5(%arg0: i32, %arg1: i32) -> (i32, i32) {
    %c0_i32 = arith.constant 0 : i32
    %c0_i32_0 = arith.constant 0 : i32
    return %arg0, %c0_i32 : i32, i32
  }
}

</mosaic_0001>

<bundles_post_ra>
// kernel: tpu_custom_call.1
= control target key start
LH: loop header
LB: loop body
LE: loop exit
PB: predicated region body
PF: predicated region fallthrough
CT: control target
= control target key end

     0   :  { %10 = vsyncpa [#allocation4], 0  ;;  %s582_s0 = inlined_call_operand.hbm [shape: f32[16,32], index: 0, kind: input, shape index: {}]   ;;  %s583_s1 = inlined_call_operand.hbm [shape: f32[32,64], index: 1, kind: input, shape index: {}]   ;;  %s584_s2 = inlined_call_operand.vmem [shape: f32[1,64], index: 2, kind: input, shape index: {}]   ;;  %s585_s3 = inlined_call_operand.hbm [shape: f32[64,128], index: 3, kind: input, shape index: {}]   ;;  %s586_s4 = inlined_call_operand.vmem [shape: f32[1,128], index: 4, kind: input, shape index: {}]   ;;  %s587_s5 = inlined_call_operand.hbm [shape: f32[16,128], index: 5, kind: output, shape index: {}]  }
   0x1   :  { %11 = vsyncpa [#allocation7], 0 }
   0x2   :  { %12 = vsyncpa [#allocation5], 0  ;;  %s471_s18 = smov [#allocation6]   ;;  %s472_s20 = smov [#allocation3]  }
   0x3   :  { %s30_s19 = sshll.u32 %s471_s18, 4  ;;  %s18_s21 = sshll.u32 %s472_s20, 4  ;;  %s31_s19 = int_to_ptr.vmem [resolvable:$true] %s30_s19  ;;  %s507_s21 = int_to_ptr.vmem [resolvable:$true] %s18_s21 }
   0x4   :  { %s377_s24 = scalar_lea.hbm %s583_s1, 512 }
   0x5   :  { %p378_p0 = scmp.ne.s32.totalorder %s583_s1, %s377_s24  ;;  %p381_p1 = scmp.lt.u32.totalorder %s377_s24, %s583_s1 }
   0x7   :  { %p383_p2 = pnand %p381_p1, %p378_p0 }
   0x9   :  { %386 = shalt.err (!%p383_p2)
}
   0xa   :  { %s387_s29 = scalar_lea.vmem %s31_s19, 512  ;;  %p392_p4 = scmp.lt.s32.totalorder %s31_s19, %s31_s19 }
   0xb   :  { %p388_p3 = scmp.ne.s32.totalorder %s31_s19, %s387_s29  ;;  %p393_p5 = scmp.lt.s32.totalorder %s387_s29, %s387_s29 }
   0xd   :  { %p394_p6 = por %p393_p5, %p392_p4 }
   0xf   :  { %p395_p7 = pnand %p394_p6, %p388_p3 }
  0x11   :  { %398 = shalt.err (!%p395_p7)
}
  0x12   :  { %s473_s30 = smov 128   ;;  %s474_s6 = smov 8  }
  0x13   :  { %36 = dma.hbm_to_vmem [thread:$0]  %s583_s1, 512, %s31_s19, [#allocation7], %s473_s30, %s473_s30, %s474_s6  }
  0x14   :  { %s399_s11 = scalar_lea.hbm %s582_s0, 256 }
  0x15   :  { %p400_p8 = scmp.ne.s32.totalorder %s582_s0, %s399_s11  ;;  %p403_p9 = scmp.lt.u32.totalorder %s399_s11, %s582_s0 }
  0x17   :  { %p405_p10 = pnand %p403_p9, %p400_p8 }
  0x19   :  { %408 = shalt.err (!%p405_p10)
}
  0x1a   :  { %s409_s16 = scalar_lea.vmem %s507_s21, 256  ;;  %p414_p12 = scmp.lt.s32.totalorder %s507_s21, %s507_s21 }
  0x1b   :  { %p410_p11 = scmp.ne.s32.totalorder %s507_s21, %s409_s16  ;;  %p415_p13 = scmp.lt.s32.totalorder %s409_s16, %s409_s16 }
  0x1d   :  { %p416_p0 = por %p415_p13, %p414_p12 }
  0x1f   :  { %p417_p1 = pnand %p416_p0, %p410_p11 }
  0x21   :  { %420 = shalt.err (!%p417_p1)
}
  0x22   :  { %24 = dma.hbm_to_vmem [thread:$0]  %s582_s0, 256, %s507_s21, [#allocation4], %s473_s30, %s473_s30, %s474_s6  }
  0x23   :  { %s475_s18 = smov [#allocation8]   ;;  %s421_s23 = scalar_lea.hbm %s585_s3, 1024 }
  0x24   :  { %s44_s19 = sshll.u32 %s475_s18, 4  ;;  %p422_p2 = scmp.ne.s32.totalorder %s585_s3, %s421_s23  ;;  %s45_s19 = int_to_ptr.vmem [resolvable:$true] %s44_s19 }
  0x25   :  { %p425_p3 = scmp.lt.u32.totalorder %s421_s23, %s585_s3 }
  0x27   :  { %p427_p4 = pnand %p425_p3, %p422_p2 }
  0x29   :  { %430 = shalt.err (!%p427_p4)
}
  0x2a   :  { %s431_s28 = scalar_lea.vmem %s45_s19, 1024  ;;  %p436_p6 = scmp.lt.s32.totalorder %s45_s19, %s45_s19 }
  0x2b   :  { %p432_p5 = scmp.ne.s32.totalorder %s45_s19, %s431_s28  ;;  %p437_p7 = scmp.lt.s32.totalorder %s431_s28, %s431_s28 }
  0x2d   :  { %p438_p8 = por %p437_p7, %p436_p6 }
  0x2f   :  { %p439_p9 = pnand %p438_p8, %p432_p5 }
  0x31   :  { %442 = shalt.err (!%p439_p9)
}
  0x32   :  { %50 = dma.hbm_to_vmem [thread:$0]  %s585_s3, 1024, %s45_s19, [#allocation7], %s473_s30, %s473_s30, %s474_s6  }
  0x33   :  { %465 = dma.done.wait [#allocation4], 256  }
  0x34   :  { %466 = vsyncadd [#allocation4], 4294967040 }
  0x35   :  { %467 = dma.done.wait [#allocation7], 1536  }
  0x36   :  { %468 = vsyncadd [#allocation7], 4294965760  ;;  %vm81_vm0 = vcmask 261120   ;;  %v70_v0 = vld [vmem:[#allocation6] sm:$0xff]  ;;  %v71_v1 = vld [vmem:[#allocation6 + $0x8] sm:$0xff]  ;;  %vm175_vm1 = vcmask 523264  }
  0x37   :  { %v72_v2 = vld [vmem:[#allocation6 + $0x10] sm:$0xff]  ;;  %v347_v3 = vpack.c.bf16 %v71_v1, %v70_v0  ;;  %v73_v4 = vld [vmem:[#allocation6 + $0x18] sm:$0xff]  ;;  %v167_v7 = vld [vmem:[#allocation8] sm:$0xff]  ;;  %s476_s9 = smov [#allocation9]  }
  0x38   :  { %v68_v5 = vld [vmem:[#allocation3] sm:$0xff]  ;;  %v351_v6 = vpack.c.bf16 %v73_v4, %v72_v2  ;;  %v168_v8 = vld [vmem:[#allocation8 + $0x8] sm:$0xff]  ;;  %v170_v11 = vld [vmem:[#allocation8 + $0x18] sm:$0xff]  ;;  %s282_s10 = sshll.u32 %s476_s9, 4  ;;  %s283_s10 = int_to_ptr.vmem [resolvable:$true] %s282_s10 }
  0x39   :  { %325 = vmatprep.mubr.msk.f32.mxu0 %vm81_vm0, %v68_v5  ;;  %v169_v9 = vld [vmem:[#allocation8 + $0x10] sm:$0xff]  ;;  %348 = vmatprep.subr.bf16.mxu0 %v347_v3  ;;  %v355_v10 = vpack.c.bf16 %v168_v8, %v167_v7  ;;  %v171_v13 = vld [vmem:[#allocation8 + $0x20] sm:$0xff]  ;;  %v172_v14 = vld [vmem:[#allocation8 + $0x28] sm:$0xff]  ;;  %p448_p11 = scmp.lt.s32.totalorder %s283_s10, %s283_s10 }
  0x3a   :  { %350 = vmatpush3.bf16.msra.mxu0 %v347_v3  ;;  %v359_v12 = vpack.c.bf16 %v170_v11, %v169_v9  ;;  %v363_v15 = vpack.c.bf16 %v172_v14, %v171_v13  ;;  %v69_v16 = vld [vmem:[#allocation3 + $0x8] sm:$0xff]  ;;  %v173_v17 = vld [vmem:[#allocation8 + $0x30] sm:$0xff] }
  0x3b   :  { %352 = vmatprep.subr.bf16.mxu0 %v351_v6  ;;  %356 = vmatprep.subr.bf16.mxu1 %v355_v10  ;;  %v174_v18 = vld [vmem:[#allocation8 + $0x38] sm:$0xff]  ;;  %v295_v20 = vld [vmem:[%s584_s2] ss:$0 sm:$0xff]  ;;  %s443_s2 = scalar_lea.vmem %s283_s10, 256 }
  0x3c   :  { %358 = vmatpush3.bf16.msra.mxu1 %v355_v10  ;;  %v367_v19 = vpack.c.bf16 %v174_v18, %v173_v17  ;;  %v300_v27 = vld [vmem:[%s586_s4] ss:$0 sm:$0xff]  ;;  %p444_p10 = scmp.ne.s32.totalorder %s283_s10, %s443_s2  ;;  %p449_p12 = scmp.lt.s32.totalorder %s443_s2, %s443_s2 }
  0x3d   :  { %360 = vmatprep.subr.bf16.mxu1 %v359_v12 }
  0x3e   :  { %354 = vmatpush3.bf16.msra.mxu0 %v351_v6  ;;  %p450_p13 = por %p449_p12, %p448_p11 }
  0x40   :  { %362 = vmatpush3.bf16.msra.mxu1 %v359_v12  ;;  %p451_p0 = pnand %p450_p13, %p444_p10 }
  0x41   :  { %326 = vmatmul.mubr.msk.f32.vlgmr.msra.gmra.mrb[0].mxu0 %vm81_vm0, %v69_v16  ;;  %364 = vmatprep.subr.bf16.mxu1 %v363_v15 }
  0x44   :  { %366 = vmatpush3.bf16.msra.mxu1 %v363_v15 }
  0x45   :  { %368 = vmatprep.subr.bf16.mxu1 %v367_v19 }
  0x48   :  { %370 = vmatpush3.bf16.msra.mxu1 %v367_v19 }
 0x114   :  { %v327_v21 = vpop.f32.mrb[0].mxu0 }
 0x115   :  { %v160_v22 = vadd.f32 %v327_v21, %v295_v20  ;;  %v154_v23 = vpop.f32.mrb[1].mxu0 }
 0x116   :  { %v155_v24 = vadd.f32 %v295_v20, %v154_v23 }
 0x117   :  { %v164_v26 = vmax.f32 %v160_v22, 0.0 }
 0x118   :  { %v163_v25 = vmax.f32 %v155_v24, 0.0 }
 0x11a   :  { %344 = vmatprep.mubr.msk.f32.mxu1 %vm175_vm1, %v163_v25 }
 0x11b   :  { %345 = vmatmul.mubr.msk.f32.vlgmr.msra.gmra.mrb[0].mxu1 %vm175_vm1, %v164_v26 }
 0x1ee   :  { %v346_v28 = vpop.f32.mrb[0].mxu1 }
 0x1ef   :  { %v274_v29 = vadd.f32 %v346_v28, %v300_v27  ;;  %v248_v30 = vpop.f32.mrb[1].mxu1 }
 0x1f0   :  { %v273_v31 = vadd.f32 %v300_v27, %v248_v30 }
 0x1f1   :  { %276 = vst [vmem:[#allocation9 + $0x8] sm:$0xff] %v274_v29 }
 0x1f2   :  { %275 = vst [vmem:[#allocation9] sm:$0xff] %v273_v31 }
 0x1f3   :  { %454 = shalt.err (!%p451_p0)
}
 0x1f4   :  { %s455_s4 = scalar_lea.hbm %s587_s5, 256 }
 0x1f5   :  { %p456_p1 = scmp.ne.s32.totalorder %s587_s5, %s455_s4  ;;  %p459_p2 = scmp.lt.u32.totalorder %s455_s4, %s587_s5 }
 0x1f7   :  { %p461_p3 = pnand %p459_p2, %p456_p1 }
 0x1f9   :  { %464 = shalt.err (!%p461_p3)
}
 0x1fa   :  { %288 = dma.vmem_to_hbm [thread:$0]  %s283_s10, 256, %s587_s5, [#allocation5], %s473_s30, %s473_s30, %s474_s6  }
 0x1fb   :  { %469 = dma.done.wait [#allocation5], 256  }
 0x1fc   :  { %470 = vsyncadd [#allocation5], 4294967040 }
 0x1fd   :  { %292 = vsyncpa [#allocation4], 1 }
 0x1fe   :  { %293 = vsyncpa [#allocation7], 1 }
 0x1ff   :  { %294 = vsyncpa [#allocation5], 1 }

// kernel: tpu_custom_call.1
= control target key start
LH: loop header
LB: loop body
LE: loop exit
PB: predicated region body
PF: predicated region fallthrough
CT: control target
= control target key end

     0   :  { %10 = vsyncpa [#allocation4], 0  ;;  %s582_s0 = inlined_call_operand.hbm [shape: f32[16,32], index: 0, kind: input, shape index: {}]   ;;  %s583_s1 = inlined_call_operand.hbm [shape: f32[32,64], index: 1, kind: input, shape index: {}]   ;;  %s584_s2 = inlined_call_operand.vmem [shape: f32[1,64], index: 2, kind: input, shape index: {}]   ;;  %s585_s3 = inlined_call_operand.hbm [shape: f32[64,128], index: 3, kind: input, shape index: {}]   ;;  %s586_s4 = inlined_call_operand.vmem [shape: f32[1,128], index: 4, kind: input, shape index: {}]   ;;  %s587_s5 = inlined_call_operand.hbm [shape: f32[16,128], index: 5, kind: output, shape index: {}]  }
   0x1   :  { %11 = vsyncpa [#allocation7], 0 }
   0x2   :  { %12 = vsyncpa [#allocation5], 0  ;;  %s471_s18 = smov [#allocation6]   ;;  %s472_s20 = smov [#allocation3]  }
   0x3   :  { %s30_s19 = sshll.u32 %s471_s18, 4  ;;  %s18_s21 = sshll.u32 %s472_s20, 4  ;;  %s31_s19 = int_to_ptr.vmem [resolvable:$true] %s30_s19  ;;  %s507_s21 = int_to_ptr.vmem [resolvable:$true] %s18_s21 }
   0x4   :  { %s377_s24 = scalar_lea.hbm %s583_s1, 512 }
   0x5   :  { %p378_p0 = scmp.ne.s32.totalorder %s583_s1, %s377_s24  ;;  %p381_p1 = scmp.lt.u32.totalorder %s377_s24, %s583_s1 }
   0x7   :  { %p383_p2 = pnand %p381_p1, %p378_p0 }
   0x9   :  { %386 = shalt.err (!%p383_p2)
}
   0xa   :  { %s387_s29 = scalar_lea.vmem %s31_s19, 512  ;;  %p392_p4 = scmp.lt.s32.totalorder %s31_s19, %s31_s19 }
   0xb   :  { %p388_p3 = scmp.ne.s32.totalorder %s31_s19, %s387_s29  ;;  %p393_p5 = scmp.lt.s32.totalorder %s387_s29, %s387_s29 }
   0xd   :  { %p394_p6 = por %p393_p5, %p392_p4 }
   0xf   :  { %p395_p7 = pnand %p394_p6, %p388_p3 }
  0x11   :  { %398 = shalt.err (!%p395_p7)
}
  0x12   :  { %s473_s30 = smov 128   ;;  %s474_s6 = smov 8  }
  0x13   :  { %36 = dma.hbm_to_vmem [thread:$0]  %s583_s1, 512, %s31_s19, [#allocation7], %s473_s30, %s473_s30, %s474_s6  }
  0x14   :  { %s399_s11 = scalar_lea.hbm %s582_s0, 256 }
  0x15   :  { %p400_p8 = scmp.ne.s32.totalorder %s582_s0, %s399_s11  ;;  %p403_p9 = scmp.lt.u32.totalorder %s399_s11, %s582_s0 }
  0x17   :  { %p405_p10 = pnand %p403_p9, %p400_p8 }
  0x19   :  { %408 = shalt.err (!%p405_p10)
}
  0x1a   :  { %s409_s16 = scalar_lea.vmem %s507_s21, 256  ;;  %p414_p12 = scmp.lt.s32.totalorder %s507_s21, %s507_s21 }
  0x1b   :  { %p410_p11 = scmp.ne.s32.totalorder %s507_s21, %s409_s16  ;;  %p415_p13 = scmp.lt.s32.totalorder %s409_s16, %s409_s16 }
  0x1d   :  { %p416_p0 = por %p415_p13, %p414_p12 }
  0x1f   :  { %p417_p1 = pnand %p416_p0, %p410_p11 }
  0x21   :  { %420 = shalt.err (!%p417_p1)
}
  0x22   :  { %24 = dma.hbm_to_vmem [thread:$0]  %s582_s0, 256, %s507_s21, [#allocation4], %s473_s30, %s473_s30, %s474_s6  }
  0x23   :  { %s475_s18 = smov [#allocation8]   ;;  %s421_s23 = scalar_lea.hbm %s585_s3, 1024 }
  0x24   :  { %s44_s19 = sshll.u32 %s475_s18, 4  ;;  %p422_p2 = scmp.ne.s32.totalorder %s585_s3, %s421_s23  ;;  %s45_s19 = int_to_ptr.vmem [resolvable:$true] %s44_s19 }
  0x25   :  { %p425_p3 = scmp.lt.u32.totalorder %s421_s23, %s585_s3 }
  0x27   :  { %p427_p4 = pnand %p425_p3, %p422_p2 }
  0x29   :  { %430 = shalt.err (!%p427_p4)
}
  0x2a   :  { %s431_s28 = scalar_lea.vmem %s45_s19, 1024  ;;  %p436_p6 = scmp.lt.s32.totalorder %s45_s19, %s45_s19 }
  0x2b   :  { %p432_p5 = scmp.ne.s32.totalorder %s45_s19, %s431_s28  ;;  %p437_p7 = scmp.lt.s32.totalorder %s431_s28, %s431_s28 }
  0x2d   :  { %p438_p8 = por %p437_p7, %p436_p6 }
  0x2f   :  { %p439_p9 = pnand %p438_p8, %p432_p5 }
  0x31   :  { %442 = shalt.err (!%p439_p9)
}
  0x32   :  { %50 = dma.hbm_to_vmem [thread:$0]  %s585_s3, 1024, %s45_s19, [#allocation7], %s473_s30, %s473_s30, %s474_s6  }
  0x33   :  { %465 = dma.done.wait [#allocation4], 256  }
  0x34   :  { %466 = vsyncadd [#allocation4], 4294967040 }
  0x35   :  { %467 = dma.done.wait [#allocation7], 1536  }
  0x36   :  { %468 = vsyncadd [#allocation7], 4294965760  ;;  %vm81_vm0 = vcmask 261120   ;;  %v70_v0 = vld [vmem:[#allocation6] sm:$0xff]  ;;  %v71_v1 = vld [vmem:[#allocation6 + $0x8] sm:$0xff]  ;;  %vm175_vm1 = vcmask 523264  }
  0x37   :  { %v72_v2 = vld [vmem:[#allocation6 + $0x10] sm:$0xff]  ;;  %v347_v3 = vpack.c.bf16 %v71_v1, %v70_v0  ;;  %v73_v4 = vld [vmem:[#allocation6 + $0x18] sm:$0xff]  ;;  %v167_v7 = vld [vmem:[#allocation8] sm:$0xff]  ;;  %s476_s9 = smov [#allocation9]  }
  0x38   :  { %v68_v5 = vld [vmem:[#allocation3] sm:$0xff]  ;;  %v351_v6 = vpack.c.bf16 %v73_v4, %v72_v2  ;;  %v168_v8 = vld [vmem:[#allocation8 + $0x8] sm:$0xff]  ;;  %v170_v11 = vld [vmem:[#allocation8 + $0x18] sm:$0xff]  ;;  %s282_s10 = sshll.u32 %s476_s9, 4  ;;  %s283_s10 = int_to_ptr.vmem [resolvable:$true] %s282_s10 }
  0x39   :  { %325 = vmatprep.mubr.msk.f32.mxu0 %vm81_vm0, %v68_v5  ;;  %v169_v9 = vld [vmem:[#allocation8 + $0x10] sm:$0xff]  ;;  %348 = vmatprep.subr.bf16.mxu0 %v347_v3  ;;  %v355_v10 = vpack.c.bf16 %v168_v8, %v167_v7  ;;  %v171_v13 = vld [vmem:[#allocation8 + $0x20] sm:$0xff]  ;;  %v172_v14 = vld [vmem:[#allocation8 + $0x28] sm:$0xff]  ;;  %p448_p11 = scmp.lt.s32.totalorder %s283_s10, %s283_s10 }
  0x3a   :  { %350 = vmatpush3.bf16.msra.mxu0 %v347_v3  ;;  %v359_v12 = vpack.c.bf16 %v170_v11, %v169_v9  ;;  %v363_v15 = vpack.c.bf16 %v172_v14, %v171_v13  ;;  %v69_v16 = vld [vmem:[#allocation3 + $0x8] sm:$0xff]  ;;  %v173_v17 = vld [vmem:[#allocation8 + $0x30] sm:$0xff] }
  0x3b   :  { %352 = vmatprep.subr.bf16.mxu0 %v351_v6  ;;  %356 = vmatprep.subr.bf16.mxu1 %v355_v10  ;;  %v174_v18 = vld [vmem:[#allocation8 + $0x38] sm:$0xff]  ;;  %v295_v20 = vld [vmem:[%s584_s2] ss:$0 sm:$0xff]  ;;  %s443_s2 = scalar_lea.vmem %s283_s10, 256 }
  0x3c   :  { %358 = vmatpush3.bf16.msra.mxu1 %v355_v10  ;;  %v367_v19 = vpack.c.bf16 %v174_v18, %v173_v17  ;;  %v300_v27 = vld [vmem:[%s586_s4] ss:$0 sm:$0xff]  ;;  %p444_p10 = scmp.ne.s32.totalorder %s283_s10, %s443_s2  ;;  %p449_p12 = scmp.lt.s32.totalorder %s443_s2, %s443_s2 }
  0x3d   :  { %360 = vmatprep.subr.bf16.mxu1 %v359_v12 }
  0x3e   :  { %354 = vmatpush3.bf16.msra.mxu0 %v351_v6  ;;  %p450_p13 = por %p449_p12, %p448_p11 }
  0x40   :  { %362 = vmatpush3.bf16.msra.mxu1 %v359_v12  ;;  %p451_p0 = pnand %p450_p13, %p444_p10 }
  0x41   :  { %326 = vmatmul.mubr.msk.f32.vlgmr.msra.gmra.mrb[0].mxu0 %vm81_vm0, %v69_v16  ;;  %364 = vmatprep.subr.bf16.mxu1 %v363_v15 }
  0x44   :  { %366 = vmatpush3.bf16.msra.mxu1 %v363_v15 }
  0x45   :  { %368 = vmatprep.subr.bf16.mxu1 %v367_v19 }
  0x48   :  { %370 = vmatpush3.bf16.msra.mxu1 %v367_v19 }
 0x114   :  { %v327_v21 = vpop.f32.mrb[0].mxu0 }
 0x115   :  { %v160_v22 = vadd.f32 %v327_v21, %v295_v20  ;;  %v154_v23 = vpop.f32.mrb[1].mxu0 }
 0x116   :  { %v155_v24 = vadd.f32 %v295_v20, %v154_v23 }
 0x117   :  { %v164_v26 = vmax.f32 %v160_v22, 0.0 }
 0x118   :  { %v163_v25 = vmax.f32 %v155_v24, 0.0 }
 0x11a   :  { %344 = vmatprep.mubr.msk.f32.mxu1 %vm175_vm1, %v163_v25 }
 0x11b   :  { %345 = vmatmul.mubr.msk.f32.vlgmr.msra.gmra.mrb[0].mxu1 %vm175_vm1, %v164_v26 }
 0x1ee   :  { %v346_v28 = vpop.f32.mrb[0].mxu1 }
 0x1ef   :  { %v274_v29 = vadd.f32 %v346_v28, %v300_v27  ;;  %v248_v30 = vpop.f32.mrb[1].mxu1 }
 0x1f0   :  { %v273_v31 = vadd.f32 %v300_v27, %v248_v30 }
 0x1f1   :  { %276 = vst [vmem:[#allocation9 + $0x8] sm:$0xff] %v274_v29 }
 0x1f2   :  { %275 = vst [vmem:[#allocation9] sm:$0xff] %v273_v31 }
 0x1f3   :  { %454 = shalt.err (!%p451_p0)
}
 0x1f4   :  { %s455_s4 = scalar_lea.hbm %s587_s5, 256 }
 0x1f5   :  { %p456_p1 = scmp.ne.s32.totalorder %s587_s5, %s455_s4  ;;  %p459_p2 = scmp.lt.u32.totalorder %s455_s4, %s587_s5 }
 0x1f7   :  { %p461_p3 = pnand %p459_p2, %p456_p1 }
 0x1f9   :  { %464 = shalt.err (!%p461_p3)
}
 0x1fa   :  { %288 = dma.vmem_to_hbm [thread:$0]  %s283_s10, 256, %s587_s5, [#allocation5], %s473_s30, %s473_s30, %s474_s6  }
 0x1fb   :  { %469 = dma.done.wait [#allocation5], 256  }
 0x1fc   :  { %470 = vsyncadd [#allocation5], 4294967040 }
 0x1fd   :  { %292 = vsyncpa [#allocation4], 1 }
 0x1fe   :  { %293 = vsyncpa [#allocation7], 1 }
 0x1ff   :  { %294 = vsyncpa [#allocation5], 1 }

</bundles_post_ra>
